<compile_context>
chip_gen: v6e
topology: v6e:2x2x1
jax: 0.10.0
libtpu: 0.0.40
codegen_flags: <defaults>
</compile_context>

<pallas_src>
import math

import jax
import jax.numpy as jnp
from jax.experimental import pallas as pl
from jax.experimental.pallas import tpu as pltpu


def calculate_max_layers(seq_len, kernel_size):
    max_layers = int(math.floor(math.log2(seq_len)))
    if 2 ** max_layers * (kernel_size - 1) > seq_len:
        max_layers -= 1
    return max_layers


# ---------------------------------------------------------------------------
# Kernel
# ---------------------------------------------------------------------------
def _make_wavenet_kernel(C_out, Lp, Bt, K, num_layers, compute_dtype,
                         elementwise_dtype):
    lanes = Bt * Lp
    KC = K * C_out

    def kernel(x_ref, wdm_ref, bdm_ref, wblk_ref, bblk_ref,
               wfin_ref, bfin_ref, out_ref, stack_ref):
        # One (C_in, Bt*Lp) slab per grid step: Bt batch segments folded onto
        # the lane axis, time within a segment on lanes, channels on sublanes.
        x = x_ref[0]                                       # already compute_dtype

        # dim matcher: 1x1 conv == (C_out, C_in) @ (C_in, lanes); weights were
        # pre-cast on the host, bias added once to the f32 accumulator.
        h = jnp.dot(wdm_ref[...], x,
                    preferred_element_type=jnp.float32) + bdm_ref[...]

        # Per-segment time index, hoisted out of the layer loop (JAX does not
        # CSE broadcast_in_dim).  Built by lane-concat (no vector int mod).
        t_seg = jax.lax.broadcasted_iota(jnp.int32, (C_out, Lp), 1)
        t_in_seg = t_seg if Bt == 1 else jnp.concatenate([t_seg] * Bt, axis=1)

        # Stacked gated dilated causal convolutions.  Static unroll:
        # num_layers <= log2(seq_len), so it is small by construction and the
        # roll shifts stay compile-time constants.
        for i in range(num_layers):
            d = 2 ** i
            th = jnp.tanh(h.astype(elementwise_dtype))
            sh = jax.nn.sigmoid(h.astype(elementwise_dtype))

            # Build the K dilated causal taps of each branch directly (in
            # compute dtype) into the persistent tap-stack scratch via static
            # row slices — no f32 concatenate is materialised.  Tap k reads
            # h[t - (K-1-k)*d]; the left-pad region carries the activation of
            # zero: tanh(0)=0, sigmoid(0)=0.5.  The roll wrap (previous
            # segment's tail) lands entirely inside that masked region since
            # shift <= Lp.
            for k in range(K):
                shift = (K - 1 - k) * d
                if shift == 0:
                    tt, ss = th, sh
                else:
                    pad = t_in_seg < shift
                    tt = jnp.where(pad, 0.0, pltpu.roll(th, shift, axis=1))
                    ss = jnp.where(pad, 0.5, pltpu.roll(sh, shift, axis=1))
                stack_ref[k * C_out:(k + 1) * C_out, :] = \
                    tt.astype(compute_dtype)
                stack_ref[(K + k) * C_out:(K + k + 1) * C_out, :] = \
                    ss.astype(compute_dtype)

            # Filter + gate fused into ONE MXU matmul per layer via the
            # block-diagonal LHS [[Wf, 0], [0, Wg]] against the stacked RHS
            # [tanh taps ; sigmoid taps]; compute dtype in, f32 accumulation.
            fg = jnp.dot(wblk_ref[i], stack_ref[...],
                         preferred_element_type=jnp.float32) + bblk_ref[i]
            h = fg[:C_out, :] * fg[C_out:, :]              # gated activation

        # final 1x1 conv + relu (this is what the module returns)
        y = jnp.dot(wfin_ref[...], h.astype(compute_dtype),
                    preferred_element_type=jnp.float32) + bfin_ref[...]
        out_ref[0] = jnp.maximum(y, 0.0).astype(out_ref.dtype)

    return kernel


# ---------------------------------------------------------------------------
# Host-side sizing helpers
# ---------------------------------------------------------------------------
def _per_batch_vmem_bytes(C_in, C_out, Lp, K, compute_dtype, out_dtype):
    """Rough per-batch-element VMEM high-watermark (bytes) for one grid step."""
    cdb = jnp.dtype(compute_dtype).itemsize
    odb = jnp.dtype(out_dtype).itemsize
    return Lp * (2 * C_in * cdb            # x block (double-buffered)
                 + 2 * C_out * odb         # out block (double-buffered)
                 + 2 * K * C_out * cdb     # tap-stack scratch
                 + 8 * C_out * 4)          # live f32 temps (h, th, sh, fg, ...)


def _choose_batch_block(B, per_batch_bytes, budget_bytes):
    """Largest divisor of B that fits the VMEM budget while keeping >= 2 grid
    steps (so the batch grid can actually shard across v7x's two TCs)."""
    best = 1
    min_steps = 2 if B >= 2 else 1
    for bt in range(1, B + 1):
        if B % bt:
            continue
        if B // bt < min_steps:
            continue
        if bt * per_batch_bytes > budget_bytes:
            continue
        best = max(best, bt)
    return best


# ---------------------------------------------------------------------------
# Wrapper
# ---------------------------------------------------------------------------
def wavenet_forward(x_ncl, params, kernel_size, *,
                    compute_dtype=jnp.bfloat16,
                    elementwise_dtype=jnp.float32,
                    out_dtype=jnp.float32,
                    batch_block=None,
                    vmem_limit_bytes=None):
    """x_ncl: (B, C_in, L) float32  ->  (B, C_out, L) out_dtype.

    compute_dtype     : MXU input dtype (bf16 on all generations; f32 for a
                        bit-faithful check).
    elementwise_dtype : dtype of tanh/sigmoid/mask math.  Keep f32 on v5e (no
                        bf16 VPU/EUP); bf16 is fine on v6e/v7x.
    out_dtype         : output dtype (bf16 halves writeback if the consumer
                        accepts it).
    batch_block       : batch elements folded onto lanes per grid step
                        (auto-chosen from the VMEM budget if None).
    """
    wdm, bdm, wf, bf, wg, bg, wfin, bfin = params
    B, C_in, L = x_ncl.shape
    C_out = wdm.shape[0]
    num_layers, K = wf.shape[0], wf.shape[1]
    assert K == kernel_size

    # Lane-dense time axis: pad L up to a multiple of 128 (causal convs never
    # look forward, so the right-pad garbage cannot contaminate t < L).
    Lp = ((L + 127) // 128) * 128

    # Per-generation VMEM limit: v7x has 64 MiB per TC, v5e/v6e 128 MiB.
    if vmem_limit_bytes is None:
        try:
            cap = pltpu.get_tpu_info().vmem_capacity_bytes
        except Exception:
            cap = 64 * 1024 * 1024          # conservative (v7x) fallback
        vmem_limit_bytes = min(int(cap * 0.8), 100 * 1024 * 1024)

    # Batch block: fold Bt batch elements onto the lane axis per grid step.
    per_b = _per_batch_vmem_bytes(C_in, C_out, Lp, K, compute_dtype, out_dtype)
    if batch_block is None:
        batch_block = _choose_batch_block(B, per_b,
                                          int(vmem_limit_bytes * 0.75))
    Bt = int(batch_block)
    assert B % Bt == 0, "batch_block must divide the batch size"
    G = B // Bt
    lanes = Bt * Lp

    # Host prep: pad, fold batch onto lanes, pre-cast activations to the MXU
    # compute dtype (halves the x DMA when compute_dtype=bf16).
    x_p = jnp.pad(x_ncl, ((0, 0), (0, 0), (0, Lp - L))).astype(compute_dtype)
    x_fold = (x_p.reshape(G, Bt, C_in, Lp)
                  .transpose(0, 2, 1, 3)
                  .reshape(G, C_in, lanes))

    # Stack the K taps along the contraction axis and fuse filter/gate into one
    # block-diagonal weight per layer: [[Wf, 0], [0, Wg]].  Pre-cast weights.
    wf_st = jnp.transpose(wf, (0, 2, 1, 3)).reshape(num_layers, C_out, K * C_out)
    wg_st = jnp.transpose(wg, (0, 2, 1, 3)).reshape(num_layers, C_out, K * C_out)
    wblk = jnp.zeros((num_layers, 2 * C_out, 2 * K * C_out), compute_dtype)
    wblk = wblk.at[:, :C_out, :K * C_out].set(wf_st.astype(compute_dtype))
    wblk = wblk.at[:, C_out:, K * C_out:].set(wg_st.astype(compute_dtype))
    bblk = jnp.concatenate([bf, bg], axis=1).astype(jnp.float32)  # (nl, 2C, 1)

    wdm_c = wdm.astype(compute_dtype)
    wfin_c = wfin.astype(compute_dtype)
    bdm_f = bdm.astype(jnp.float32)
    bfin_f = bfin.astype(jnp.float32)

    kernel = _make_wavenet_kernel(C_out, Lp, Bt, K, num_layers,
                                  compute_dtype, elementwise_dtype)

    out = pl.pallas_call(
        kernel,
        out_shape=jax.ShapeDtypeStruct((G, C_out, lanes), out_dtype),
        grid=(G,),
        in_specs=[
            pl.BlockSpec((1, C_in, lanes), lambda g: (g, 0, 0)),            # x
            pl.BlockSpec((C_out, C_in), lambda g: (0, 0)),                  # wdm
            pl.BlockSpec((C_out, 1), lambda g: (0, 0)),                     # bdm
            pl.BlockSpec((num_layers, 2 * C_out, 2 * K * C_out),
                         lambda g: (0, 0, 0)),                              # wblk
            pl.BlockSpec((num_layers, 2 * C_out, 1), lambda g: (0, 0, 0)),  # bblk
            pl.BlockSpec((C_out, C_out), lambda g: (0, 0)),                 # wfin
            pl.BlockSpec((C_out, 1), lambda g: (0, 0)),                     # bfin
        ],
        out_specs=pl.BlockSpec((1, C_out, lanes), lambda g: (g, 0, 0)),
        scratch_shapes=[pltpu.VMEM((2 * K * C_out, lanes), compute_dtype)],
        compiler_params=pltpu.CompilerParams(
            dimension_semantics=("parallel",),   # batch grid across TCs (v7x)
            vmem_limit_bytes=int(vmem_limit_bytes),
        ),
    )(x_fold, wdm_c, bdm_f, wblk, bblk, wfin_c, bfin_f)

    # Unfold batch and drop the lane padding.  (Downstream consumers that can
    # accept the Lp-padded layout can skip this slice copy.)
    out = (out.reshape(G, C_out, Bt, Lp)
              .transpose(0, 2, 1, 3)
              .reshape(B, C_out, Lp))
    return out[:, :, :L]


# ---------------------------------------------------------------------------
# Plain-JAX f32 reference (identical math, for correctness checks)
# ---------------------------------------------------------------------------
def wavenet_reference(x_ncl, params, kernel_size):
    wdm, bdm, wf, bf, wg, bg, wfin, bfin = params
    num_layers, K = wf.shape[0], wf.shape[1]
    L = x_ncl.shape[-1]

    h = jnp.einsum('oc,bcl->bol', wdm, x_ncl) + bdm[None]       # (B, C_out, L)
    for i in range(num_layers):
        d = 2 ** i
        pad = (K - 1) * d
        t = jnp.pad(jnp.tanh(h), ((0, 0), (0, 0), (pad, 0)), constant_values=0.0)
        s = jnp.pad(jax.nn.sigmoid(h), ((0, 0), (0, 0), (pad, 0)),
                    constant_values=0.5)
        f_out = jnp.zeros_like(h) + bf[i][None]
        g_out = jnp.zeros_like(h) + bg[i][None]
        for k in range(K):
            f_out = f_out + jnp.einsum('oc,bcl->bol', wf[i, k],
                                       t[:, :, k * d:k * d + L])
            g_out = g_out + jnp.einsum('oc,bcl->bol', wg[i, k],
                                       s[:, :, k * d:k * d + L])
        h = f_out * g_out
    y = jnp.einsum('oc,bcl->bol', wfin, h) + bfin[None]
    return jnp.maximum(y, 0.0)


if __name__ == "__main__":
    # Module hyperparameters (small, consistent with the forward pass).
    B, C_in, C_out, L, K = 2, 4, 8, 16, 2
    num_layers = calculate_max_layers(L, K)          # = 4, dilations 1,2,4,8

    key = jax.random.PRNGKey(0)
    ks = jax.random.split(key, 9)
    # Deterministic synthetic parameters (PyTorch Conv1d-style: W[c_out, c_in]
    # per tap, bias broadcast over time).
    wdm  = 0.3 * jax.random.normal(ks[0], (C_out, C_in), jnp.float32)
    bdm  = 0.1 * jax.random.normal(ks[1], (C_out, 1), jnp.float32)
    wf   = 0.3 * jax.random.normal(ks[2], (num_layers, K, C_out, C_out), jnp.float32)
    bf   = 0.1 * jax.random.normal(ks[3], (num_layers, C_out, 1), jnp.float32)
    wg   = 0.3 * jax.random.normal(ks[4], (num_layers, K, C_out, C_out), jnp.float32)
    bg   = 0.1 * jax.random.normal(ks[5], (num_layers, C_out, 1), jnp.float32)
    wfin = 0.3 * jax.random.normal(ks[6], (C_out, C_out), jnp.float32)
    bfin = 0.1 * jax.random.normal(ks[7], (C_out, 1), jnp.float32)
    params = (wdm, bdm, wf, bf, wg, bg, wfin, bfin)

    x = jax.random.normal(ks[8], (B, C_in, L), jnp.float32)      # NCL, like PyTorch

    ref = jax.block_until_ready(wavenet_reference(x, params, K))

    # f32 MXU path: bit-faithful semantic check against the plain-JAX reference.
    out_f32 = jax.block_until_ready(
        wavenet_forward(x, params, K, compute_dtype=jnp.float32))
    assert out_f32.shape == (B, C_out, L)
    assert jnp.allclose(out_f32, ref, rtol=1e-3, atol=1e-3), "f32 mismatch"

    # Folded-batch path (Bt=2 -> batch on lanes, single grid step), f32 check:
    # exercises the per-segment pad mask and the roll wrap-around across the
    # segment boundary.
    out_fold = jax.block_until_ready(
        wavenet_forward(x, params, K, compute_dtype=jnp.float32, batch_block=2))
    assert jnp.allclose(out_fold, ref, rtol=1e-3, atol=1e-3), "folded-batch mismatch"

    # bf16 MXU / f32 elementwise (the default perf configuration): looser tol.
    out_bf16 = jax.block_until_ready(wavenet_forward(x, params, K))
    assert out_bf16.shape == (B, C_out, L)
    assert jnp.allclose(out_bf16, ref, rtol=1e-1, atol=5e-2), "bf16 mismatch"

    # Full-bf16 option (v6e/v7x: bf16 VPU/EUP, bf16 writeback): sanity check.
    out_bf16e = jax.block_until_ready(
        wavenet_forward(x, params, K, elementwise_dtype=jnp.bfloat16,
                        out_dtype=jnp.bfloat16))
    out_bf16e_f = out_bf16e.astype(jnp.float32)
    assert out_bf16e.shape == (B, C_out, L)
    assert bool(jnp.isfinite(out_bf16e_f).all())
    assert float(jnp.max(jnp.abs(out_bf16e_f - ref))) < 0.5

    print("KERNEL_OK")
</pallas_src>

<mosaic_0001>
module attributes {stable_mosaic.version = 11 : i64} {
  func.func @kernel(%arg0: i32, %arg1: memref<1x4x128xf32, #tpu.memory_space<vmem>>, %arg2: memref<8x4xf32, #tpu.memory_space<vmem>>, %arg3: memref<8x1xf32, #tpu.memory_space<vmem>>, %arg4: memref<4x16x32xf32, #tpu.memory_space<vmem>>, %arg5: memref<4x16x1xf32, #tpu.memory_space<vmem>>, %arg6: memref<8x8xf32, #tpu.memory_space<vmem>>, %arg7: memref<8x1xf32, #tpu.memory_space<vmem>>, %arg8: memref<1x8x128xf32, #tpu.memory_space<vmem>>, %arg9: memref<32x128xf32, #tpu.memory_space<vmem>>) attributes {dimension_semantics = [#tpu.dimension_semantics<parallel>], iteration_bounds = array<i64: 2>, scalar_prefetch = 0 : i64, scratch_operands = 1 : i64, tpu.core_type = #tpu.core_type<tc>, window_params = [{transform_indices = @transform_0, window_bounds = array<i64: 1, 4, 128>}, {pipeline_mode = #tpu.pipeline_mode<synchronous>, transform_indices = @transform_1, window_bounds = array<i64: 8, 4>}, {pipeline_mode = #tpu.pipeline_mode<synchronous>, transform_indices = @transform_2, window_bounds = array<i64: 8, 1>}, {pipeline_mode = #tpu.pipeline_mode<synchronous>, transform_indices = @transform_3, window_bounds = array<i64: 4, 16, 32>}, {pipeline_mode = #tpu.pipeline_mode<synchronous>, transform_indices = @transform_4, window_bounds = array<i64: 4, 16, 1>}, {pipeline_mode = #tpu.pipeline_mode<synchronous>, transform_indices = @transform_5, window_bounds = array<i64: 8, 8>}, {pipeline_mode = #tpu.pipeline_mode<synchronous>, transform_indices = @transform_6, window_bounds = array<i64: 8, 1>}, {transform_indices = @transform_7, window_bounds = array<i64: 1, 8, 128>}]} {
    %c0 = arith.constant 0 : index
    %c0_0 = arith.constant 0 : index
    %c0_1 = arith.constant 0 : index
    %0 = vector.load %arg1[%c0, %c0_0, %c0_1] : memref<1x4x128xf32, #tpu.memory_space<vmem>>, vector<1x4x128xf32>
    %1 = vector.shape_cast %0 : vector<1x4x128xf32> to vector<4x128xf32>
    %c0_2 = arith.constant 0 : index
    %c0_3 = arith.constant 0 : index
    %2 = vector.load %arg2[%c0_2, %c0_3] : memref<8x4xf32, #tpu.memory_space<vmem>>, vector<8x4xf32>
    %cst = arith.constant dense<0.000000e+00> : vector<8x128xf32>
    %3 = tpu.matmul %2, %1, %cst {dimension_numbers = #tpu.dot_dimension_numbers<[1], [0], [0], [1], [0, 0, 1, 1], [], []>} : vector<8x4xf32>, vector<4x128xf32>, vector<8x128xf32> -> vector<8x128xf32>
    %c0_4 = arith.constant 0 : index
    %c0_5 = arith.constant 0 : index
    %4 = vector.load %arg3[%c0_4, %c0_5] : memref<8x1xf32, #tpu.memory_space<vmem>>, vector<8x1xf32>
    %5 = vector.broadcast %4 : vector<8x1xf32> to vector<8x128xf32>
    %6 = arith.addf %3, %5 : vector<8x128xf32>
    %7 = tpu.iota {dimensions = array<i32: 1>} : vector<8x128xi32>
    %8 = math.tanh %6 : vector<8x128xf32>
    %9 = arith.negf %6 : vector<8x128xf32>
    %10 = math.exp %9 : vector<8x128xf32>
    %cst_6 = arith.constant 1.000000e+00 : f32
    %11 = vector.broadcast %cst_6 : f32 to vector<8x128xf32>
    %12 = arith.addf %11, %10 : vector<8x128xf32>
    %13 = arith.divf %11, %12 : vector<8x128xf32>
    %c1_i32 = arith.constant 1 : i32
    %14 = vector.broadcast %c1_i32 : i32 to vector<8x128xi32>
    %15 = arith.cmpi slt, %7, %14 : vector<8x128xi32>
    %c1_i32_7 = arith.constant 1 : i32
    %16 = tpu.dynamic_rotate %8 by %c1_i32_7 dim 1 : vector<8x128xf32>, i32 -> vector<8x128xf32>
    %cst_8 = arith.constant 0.000000e+00 : f32
    %17 = vector.broadcast %cst_8 : f32 to vector<8x128xf32>
    %18 = arith.select %15, %17, %16 : vector<8x128xi1>, vector<8x128xf32>
    %c1_i32_9 = arith.constant 1 : i32
    %19 = tpu.dynamic_rotate %13 by %c1_i32_9 dim 1 : vector<8x128xf32>, i32 -> vector<8x128xf32>
    %cst_10 = arith.constant 5.000000e-01 : f32
    %20 = vector.broadcast %cst_10 : f32 to vector<8x128xf32>
    %21 = arith.select %15, %20, %19 : vector<8x128xi1>, vector<8x128xf32>
    %c0_11 = arith.constant 0 : index
    %c0_12 = arith.constant 0 : index
    %22 = vector.load %arg9[%c0_11, %c0_12] : memref<32x128xf32, #tpu.memory_space<vmem>>, vector<8x128xf32>
    tpu.vector_store %arg9[%c0_11, %c0_12], %18 {strides = array<i32>} : memref<32x128xf32, #tpu.memory_space<vmem>>, vector<8x128xf32>,
    %c16 = arith.constant 16 : index
    %c0_13 = arith.constant 0 : index
    %23 = vector.load %arg9[%c16, %c0_13] : memref<32x128xf32, #tpu.memory_space<vmem>>, vector<8x128xf32>
    tpu.vector_store %arg9[%c16, %c0_13], %21 {strides = array<i32>} : memref<32x128xf32, #tpu.memory_space<vmem>>, vector<8x128xf32>,
    %c8 = arith.constant 8 : index
    %c0_14 = arith.constant 0 : index
    %24 = vector.load %arg9[%c8, %c0_14] : memref<32x128xf32, #tpu.memory_space<vmem>>, vector<8x128xf32>
    tpu.vector_store %arg9[%c8, %c0_14], %8 {strides = array<i32>} : memref<32x128xf32, #tpu.memory_space<vmem>>, vector<8x128xf32>,
    %c24 = arith.constant 24 : index
    %c0_15 = arith.constant 0 : index
    %25 = vector.load %arg9[%c24, %c0_15] : memref<32x128xf32, #tpu.memory_space<vmem>>, vector<8x128xf32>
    tpu.vector_store %arg9[%c24, %c0_15], %13 {strides = array<i32>} : memref<32x128xf32, #tpu.memory_space<vmem>>, vector<8x128xf32>,
    %c0_16 = arith.constant 0 : index
    %c0_17 = arith.constant 0 : index
    %c0_18 = arith.constant 0 : index
    %26 = vector.load %arg4[%c0_16, %c0_17, %c0_18] : memref<4x16x32xf32, #tpu.memory_space<vmem>>, vector<1x16x32xf32>
    %27 = vector.shape_cast %26 : vector<1x16x32xf32> to vector<16x32xf32>
    %c0_19 = arith.constant 0 : index
    %c0_20 = arith.constant 0 : index
    %28 = vector.load %arg9[%c0_19, %c0_20] : memref<32x128xf32, #tpu.memory_space<vmem>>, vector<32x128xf32>
    %cst_21 = arith.constant dense<0.000000e+00> : vector<16x128xf32>
    %29 = tpu.matmul %27, %28, %cst_21 {dimension_numbers = #tpu.dot_dimension_numbers<[1], [0], [0], [1], [0, 0, 1, 1], [], []>} : vector<16x32xf32>, vector<32x128xf32>, vector<16x128xf32> -> vector<16x128xf32>
    %c0_22 = arith.constant 0 : index
    %c0_23 = arith.constant 0 : index
    %c0_24 = arith.constant 0 : index
    %30 = vector.load %arg5[%c0_22, %c0_23, %c0_24] : memref<4x16x1xf32, #tpu.memory_space<vmem>>, vector<1x16x1xf32>
    %31 = vector.shape_cast %30 : vector<1x16x1xf32> to vector<16x1xf32>
    %32 = vector.broadcast %31 : vector<16x1xf32> to vector<16x128xf32>
    %33 = arith.addf %29, %32 : vector<16x128xf32>
    %34 = vector.extract_strided_slice %33 {offsets = [0, 0], sizes = [8, 128], strides = [1, 1]} : vector<16x128xf32> to vector<8x128xf32>
    %35 = vector.extract_strided_slice %33 {offsets = [8, 0], sizes = [8, 128], strides = [1, 1]} : vector<16x128xf32> to vector<8x128xf32>
    %36 = arith.mulf %34, %35 : vector<8x128xf32>
    %37 = math.tanh %36 : vector<8x128xf32>
    %38 = arith.negf %36 : vector<8x128xf32>
    %39 = math.exp %38 : vector<8x128xf32>
    %cst_25 = arith.constant 1.000000e+00 : f32
    %40 = vector.broadcast %cst_25 : f32 to vector<8x128xf32>
    %41 = arith.addf %40, %39 : vector<8x128xf32>
    %42 = arith.divf %40, %41 : vector<8x128xf32>
    %c2_i32 = arith.constant 2 : i32
    %43 = vector.broadcast %c2_i32 : i32 to vector<8x128xi32>
    %44 = arith.cmpi slt, %7, %43 : vector<8x128xi32>
    %c2_i32_26 = arith.constant 2 : i32
    %45 = tpu.dynamic_rotate %37 by %c2_i32_26 dim 1 : vector<8x128xf32>, i32 -> vector<8x128xf32>
    %cst_27 = arith.constant 0.000000e+00 : f32
    %46 = vector.broadcast %cst_27 : f32 to vector<8x128xf32>
    %47 = arith.select %44, %46, %45 : vector<8x128xi1>, vector<8x128xf32>
    %c2_i32_28 = arith.constant 2 : i32
    %48 = tpu.dynamic_rotate %42 by %c2_i32_28 dim 1 : vector<8x128xf32>, i32 -> vector<8x128xf32>
    %cst_29 = arith.constant 5.000000e-01 : f32
    %49 = vector.broadcast %cst_29 : f32 to vector<8x128xf32>
    %50 = arith.select %44, %49, %48 : vector<8x128xi1>, vector<8x128xf32>
    %c0_30 = arith.constant 0 : index
    %c0_31 = arith.constant 0 : index
    %51 = vector.load %arg9[%c0_30, %c0_31] : memref<32x128xf32, #tpu.memory_space<vmem>>, vector<8x128xf32>
    tpu.vector_store %arg9[%c0_30, %c0_31], %47 {strides = array<i32>} : memref<32x128xf32, #tpu.memory_space<vmem>>, vector<8x128xf32>,
    %c16_32 = arith.constant 16 : index
    %c0_33 = arith.constant 0 : index
    %52 = vector.load %arg9[%c16_32, %c0_33] : memref<32x128xf32, #tpu.memory_space<vmem>>, vector<8x128xf32>
    tpu.vector_store %arg9[%c16_32, %c0_33], %50 {strides = array<i32>} : memref<32x128xf32, #tpu.memory_space<vmem>>, vector<8x128xf32>,
    %c8_34 = arith.constant 8 : index
    %c0_35 = arith.constant 0 : index
    %53 = vector.load %arg9[%c8_34, %c0_35] : memref<32x128xf32, #tpu.memory_space<vmem>>, vector<8x128xf32>
    tpu.vector_store %arg9[%c8_34, %c0_35], %37 {strides = array<i32>} : memref<32x128xf32, #tpu.memory_space<vmem>>, vector<8x128xf32>,
    %c24_36 = arith.constant 24 : index
    %c0_37 = arith.constant 0 : index
    %54 = vector.load %arg9[%c24_36, %c0_37] : memref<32x128xf32, #tpu.memory_space<vmem>>, vector<8x128xf32>
    tpu.vector_store %arg9[%c24_36, %c0_37], %42 {strides = array<i32>} : memref<32x128xf32, #tpu.memory_space<vmem>>, vector<8x128xf32>,
    %c1 = arith.constant 1 : index
    %c0_38 = arith.constant 0 : index
    %c0_39 = arith.constant 0 : index
    %55 = vector.load %arg4[%c1, %c0_38, %c0_39] : memref<4x16x32xf32, #tpu.memory_space<vmem>>, vector<1x16x32xf32>
    %56 = vector.shape_cast %55 : vector<1x16x32xf32> to vector<16x32xf32>
    %c0_40 = arith.constant 0 : index
    %c0_41 = arith.constant 0 : index
    %57 = vector.load %arg9[%c0_40, %c0_41] : memref<32x128xf32, #tpu.memory_space<vmem>>, vector<32x128xf32>
    %cst_42 = arith.constant dense<0.000000e+00> : vector<16x128xf32>
    %58 = tpu.matmul %56, %57, %cst_42 {dimension_numbers = #tpu.dot_dimension_numbers<[1], [0], [0], [1], [0, 0, 1, 1], [], []>} : vector<16x32xf32>, vector<32x128xf32>, vector<16x128xf32> -> vector<16x128xf32>
    %c1_43 = arith.constant 1 : index
    %c0_44 = arith.constant 0 : index
    %c0_45 = arith.constant 0 : index
    %59 = vector.load %arg5[%c1_43, %c0_44, %c0_45] : memref<4x16x1xf32, #tpu.memory_space<vmem>>, vector<1x16x1xf32>
    %60 = vector.shape_cast %59 : vector<1x16x1xf32> to vector<16x1xf32>
    %61 = vector.broadcast %60 : vector<16x1xf32> to vector<16x128xf32>
    %62 = arith.addf %58, %61 : vector<16x128xf32>
    %63 = vector.extract_strided_slice %62 {offsets = [0, 0], sizes = [8, 128], strides = [1, 1]} : vector<16x128xf32> to vector<8x128xf32>
    %64 = vector.extract_strided_slice %62 {offsets = [8, 0], sizes = [8, 128], strides = [1, 1]} : vector<16x128xf32> to vector<8x128xf32>
    %65 = arith.mulf %63, %64 : vector<8x128xf32>
    %66 = math.tanh %65 : vector<8x128xf32>
    %67 = arith.negf %65 : vector<8x128xf32>
    %68 = math.exp %67 : vector<8x128xf32>
    %cst_46 = arith.constant 1.000000e+00 : f32
    %69 = vector.broadcast %cst_46 : f32 to vector<8x128xf32>
    %70 = arith.addf %69, %68 : vector<8x128xf32>
    %71 = arith.divf %69, %70 : vector<8x128xf32>
    %c4_i32 = arith.constant 4 : i32
    %72 = vector.broadcast %c4_i32 : i32 to vector<8x128xi32>
    %73 = arith.cmpi slt, %7, %72 : vector<8x128xi32>
    %c4_i32_47 = arith.constant 4 : i32
    %74 = tpu.dynamic_rotate %66 by %c4_i32_47 dim 1 : vector<8x128xf32>, i32 -> vector<8x128xf32>
    %cst_48 = arith.constant 0.000000e+00 : f32
    %75 = vector.broadcast %cst_48 : f32 to vector<8x128xf32>
    %76 = arith.select %73, %75, %74 : vector<8x128xi1>, vector<8x128xf32>
    %c4_i32_49 = arith.constant 4 : i32
    %77 = tpu.dynamic_rotate %71 by %c4_i32_49 dim 1 : vector<8x128xf32>, i32 -> vector<8x128xf32>
    %cst_50 = arith.constant 5.000000e-01 : f32
    %78 = vector.broadcast %cst_50 : f32 to vector<8x128xf32>
    %79 = arith.select %73, %78, %77 : vector<8x128xi1>, vector<8x128xf32>
    %c0_51 = arith.constant 0 : index
    %c0_52 = arith.constant 0 : index
    %80 = vector.load %arg9[%c0_51, %c0_52] : memref<32x128xf32, #tpu.memory_space<vmem>>, vector<8x128xf32>
    tpu.vector_store %arg9[%c0_51, %c0_52], %76 {strides = array<i32>} : memref<32x128xf32, #tpu.memory_space<vmem>>, vector<8x128xf32>,
    %c16_53 = arith.constant 16 : index
    %c0_54 = arith.constant 0 : index
    %81 = vector.load %arg9[%c16_53, %c0_54] : memref<32x128xf32, #tpu.memory_space<vmem>>, vector<8x128xf32>
    tpu.vector_store %arg9[%c16_53, %c0_54], %79 {strides = array<i32>} : memref<32x128xf32, #tpu.memory_space<vmem>>, vector<8x128xf32>,
    %c8_55 = arith.constant 8 : index
    %c0_56 = arith.constant 0 : index
    %82 = vector.load %arg9[%c8_55, %c0_56] : memref<32x128xf32, #tpu.memory_space<vmem>>, vector<8x128xf32>
    tpu.vector_store %arg9[%c8_55, %c0_56], %66 {strides = array<i32>} : memref<32x128xf32, #tpu.memory_space<vmem>>, vector<8x128xf32>,
    %c24_57 = arith.constant 24 : index
    %c0_58 = arith.constant 0 : index
    %83 = vector.load %arg9[%c24_57, %c0_58] : memref<32x128xf32, #tpu.memory_space<vmem>>, vector<8x128xf32>
    tpu.vector_store %arg9[%c24_57, %c0_58], %71 {strides = array<i32>} : memref<32x128xf32, #tpu.memory_space<vmem>>, vector<8x128xf32>,
    %c2 = arith.constant 2 : index
    %c0_59 = arith.constant 0 : index
    %c0_60 = arith.constant 0 : index
    %84 = vector.load %arg4[%c2, %c0_59, %c0_60] : memref<4x16x32xf32, #tpu.memory_space<vmem>>, vector<1x16x32xf32>
    %85 = vector.shape_cast %84 : vector<1x16x32xf32> to vector<16x32xf32>
    %c0_61 = arith.constant 0 : index
    %c0_62 = arith.constant 0 : index
    %86 = vector.load %arg9[%c0_61, %c0_62] : memref<32x128xf32, #tpu.memory_space<vmem>>, vector<32x128xf32>
    %cst_63 = arith.constant dense<0.000000e+00> : vector<16x128xf32>
    %87 = tpu.matmul %85, %86, %cst_63 {dimension_numbers = #tpu.dot_dimension_numbers<[1], [0], [0], [1], [0, 0, 1, 1], [], []>} : vector<16x32xf32>, vector<32x128xf32>, vector<16x128xf32> -> vector<16x128xf32>
    %c2_64 = arith.constant 2 : index
    %c0_65 = arith.constant 0 : index
    %c0_66 = arith.constant 0 : index
    %88 = vector.load %arg5[%c2_64, %c0_65, %c0_66] : memref<4x16x1xf32, #tpu.memory_space<vmem>>, vector<1x16x1xf32>
    %89 = vector.shape_cast %88 : vector<1x16x1xf32> to vector<16x1xf32>
    %90 = vector.broadcast %89 : vector<16x1xf32> to vector<16x128xf32>
    %91 = arith.addf %87, %90 : vector<16x128xf32>
    %92 = vector.extract_strided_slice %91 {offsets = [0, 0], sizes = [8, 128], strides = [1, 1]} : vector<16x128xf32> to vector<8x128xf32>
    %93 = vector.extract_strided_slice %91 {offsets = [8, 0], sizes = [8, 128], strides = [1, 1]} : vector<16x128xf32> to vector<8x128xf32>
    %94 = arith.mulf %92, %93 : vector<8x128xf32>
    %95 = math.tanh %94 : vector<8x128xf32>
    %96 = arith.negf %94 : vector<8x128xf32>
    %97 = math.exp %96 : vector<8x128xf32>
    %cst_67 = arith.constant 1.000000e+00 : f32
    %98 = vector.broadcast %cst_67 : f32 to vector<8x128xf32>
    %99 = arith.addf %98, %97 : vector<8x128xf32>
    %100 = arith.divf %98, %99 : vector<8x128xf32>
    %c8_i32 = arith.constant 8 : i32
    %101 = vector.broadcast %c8_i32 : i32 to vector<8x128xi32>
    %102 = arith.cmpi slt, %7, %101 : vector<8x128xi32>
    %c8_i32_68 = arith.constant 8 : i32
    %103 = tpu.dynamic_rotate %95 by %c8_i32_68 dim 1 : vector<8x128xf32>, i32 -> vector<8x128xf32>
    %cst_69 = arith.constant 0.000000e+00 : f32
    %104 = vector.broadcast %cst_69 : f32 to vector<8x128xf32>
    %105 = arith.select %102, %104, %103 : vector<8x128xi1>, vector<8x128xf32>
    %c8_i32_70 = arith.constant 8 : i32
    %106 = tpu.dynamic_rotate %100 by %c8_i32_70 dim 1 : vector<8x128xf32>, i32 -> vector<8x128xf32>
    %cst_71 = arith.constant 5.000000e-01 : f32
    %107 = vector.broadcast %cst_71 : f32 to vector<8x128xf32>
    %108 = arith.select %102, %107, %106 : vector<8x128xi1>, vector<8x128xf32>
    %c0_72 = arith.constant 0 : index
    %c0_73 = arith.constant 0 : index
    %109 = vector.load %arg9[%c0_72, %c0_73] : memref<32x128xf32, #tpu.memory_space<vmem>>, vector<8x128xf32>
    tpu.vector_store %arg9[%c0_72, %c0_73], %105 {strides = array<i32>} : memref<32x128xf32, #tpu.memory_space<vmem>>, vector<8x128xf32>,
    %c16_74 = arith.constant 16 : index
    %c0_75 = arith.constant 0 : index
    %110 = vector.load %arg9[%c16_74, %c0_75] : memref<32x128xf32, #tpu.memory_space<vmem>>, vector<8x128xf32>
    tpu.vector_store %arg9[%c16_74, %c0_75], %108 {strides = array<i32>} : memref<32x128xf32, #tpu.memory_space<vmem>>, vector<8x128xf32>,
    %c8_76 = arith.constant 8 : index
    %c0_77 = arith.constant 0 : index
    %111 = vector.load %arg9[%c8_76, %c0_77] : memref<32x128xf32, #tpu.memory_space<vmem>>, vector<8x128xf32>
    tpu.vector_store %arg9[%c8_76, %c0_77], %95 {strides = array<i32>} : memref<32x128xf32, #tpu.memory_space<vmem>>, vector<8x128xf32>,
    %c24_78 = arith.constant 24 : index
    %c0_79 = arith.constant 0 : index
    %112 = vector.load %arg9[%c24_78, %c0_79] : memref<32x128xf32, #tpu.memory_space<vmem>>, vector<8x128xf32>
    tpu.vector_store %arg9[%c24_78, %c0_79], %100 {strides = array<i32>} : memref<32x128xf32, #tpu.memory_space<vmem>>, vector<8x128xf32>,
    %c3 = arith.constant 3 : index
    %c0_80 = arith.constant 0 : index
    %c0_81 = arith.constant 0 : index
    %113 = vector.load %arg4[%c3, %c0_80, %c0_81] : memref<4x16x32xf32, #tpu.memory_space<vmem>>, vector<1x16x32xf32>
    %114 = vector.shape_cast %113 : vector<1x16x32xf32> to vector<16x32xf32>
    %c0_82 = arith.constant 0 : index
    %c0_83 = arith.constant 0 : index
    %115 = vector.load %arg9[%c0_82, %c0_83] : memref<32x128xf32, #tpu.memory_space<vmem>>, vector<32x128xf32>
    %cst_84 = arith.constant dense<0.000000e+00> : vector<16x128xf32>
    %116 = tpu.matmul %114, %115, %cst_84 {dimension_numbers = #tpu.dot_dimension_numbers<[1], [0], [0], [1], [0, 0, 1, 1], [], []>} : vector<16x32xf32>, vector<32x128xf32>, vector<16x128xf32> -> vector<16x128xf32>
    %c3_85 = arith.constant 3 : index
    %c0_86 = arith.constant 0 : index
    %c0_87 = arith.constant 0 : index
    %117 = vector.load %arg5[%c3_85, %c0_86, %c0_87] : memref<4x16x1xf32, #tpu.memory_space<vmem>>, vector<1x16x1xf32>
    %118 = vector.shape_cast %117 : vector<1x16x1xf32> to vector<16x1xf32>
    %119 = vector.broadcast %118 : vector<16x1xf32> to vector<16x128xf32>
    %120 = arith.addf %116, %119 : vector<16x128xf32>
    %121 = vector.extract_strided_slice %120 {offsets = [0, 0], sizes = [8, 128], strides = [1, 1]} : vector<16x128xf32> to vector<8x128xf32>
    %122 = vector.extract_strided_slice %120 {offsets = [8, 0], sizes = [8, 128], strides = [1, 1]} : vector<16x128xf32> to vector<8x128xf32>
    %123 = arith.mulf %121, %122 : vector<8x128xf32>
    %c0_88 = arith.constant 0 : index
    %c0_89 = arith.constant 0 : index
    %124 = vector.load %arg6[%c0_88, %c0_89] : memref<8x8xf32, #tpu.memory_space<vmem>>, vector<8x8xf32>
    %cst_90 = arith.constant dense<0.000000e+00> : vector<8x128xf32>
    %125 = tpu.matmul %124, %123, %cst_90 {dimension_numbers = #tpu.dot_dimension_numbers<[1], [0], [0], [1], [0, 0, 1, 1], [], []>} : vector<8x8xf32>, vector<8x128xf32>, vector<8x128xf32> -> vector<8x128xf32>
    %c0_91 = arith.constant 0 : index
    %c0_92 = arith.constant 0 : index
    %126 = vector.load %arg7[%c0_91, %c0_92] : memref<8x1xf32, #tpu.memory_space<vmem>>, vector<8x1xf32>
    %127 = vector.broadcast %126 : vector<8x1xf32> to vector<8x128xf32>
    %128 = arith.addf %125, %127 : vector<8x128xf32>
    %cst_93 = arith.constant 0.000000e+00 : f32
    %129 = vector.broadcast %cst_93 : f32 to vector<8x128xf32>
    %130 = arith.maximumf %128, %129 : vector<8x128xf32>
    %c0_94 = arith.constant 0 : index
    %c0_95 = arith.constant 0 : index
    %c0_96 = arith.constant 0 : index
    %131 = vector.load %arg8[%c0_94, %c0_95, %c0_96] : memref<1x8x128xf32, #tpu.memory_space<vmem>>, vector<1x8x128xf32>
    %132 = vector.shape_cast %131 : vector<1x8x128xf32> to vector<8x128xf32>
    %133 = vector.shape_cast %130 : vector<8x128xf32> to vector<1x8x128xf32>
    tpu.vector_store %arg8[%c0_94, %c0_95, %c0_96], %133 {strides = array<i32>} : memref<1x8x128xf32, #tpu.memory_space<vmem>>, vector<1x8x128xf32>,
    return
  }
  func.func @transform_0(%arg0: i32) -> (i32, i32, i32) {
    %c0_i32 = arith.constant 0 : i32
    %c0_i32_0 = arith.constant 0 : i32
    %c0_i32_1 = arith.constant 0 : i32
    return %arg0, %c0_i32, %c0_i32_0 : i32, i32, i32
  }
  func.func @transform_1(%arg0: i32) -> (i32, i32) {
    %c0_i32 = arith.constant 0 : i32
    %c0_i32_0 = arith.constant 0 : i32
    %c0_i32_1 = arith.constant 0 : i32
    return %c0_i32, %c0_i32_0 : i32, i32
  }
  func.func @transform_2(%arg0: i32) -> (i32, i32) {
    %c0_i32 = arith.constant 0 : i32
    %c0_i32_0 = arith.constant 0 : i32
    %c0_i32_1 = arith.constant 0 : i32
    return %c0_i32, %c0_i32_0 : i32, i32
  }
  func.func @transform_3(%arg0: i32) -> (i32, i32, i32) {
    %c0_i32 = arith.constant 0 : i32
    %c0_i32_0 = arith.constant 0 : i32
    %c0_i32_1 = arith.constant 0 : i32
    %c0_i32_2 = arith.constant 0 : i32
    return %c0_i32, %c0_i32_0, %c0_i32_1 : i32, i32, i32
  }
  func.func @transform_4(%arg0: i32) -> (i32, i32, i32) {
    %c0_i32 = arith.constant 0 : i32
    %c0_i32_0 = arith.constant 0 : i32
    %c0_i32_1 = arith.constant 0 : i32
    %c0_i32_2 = arith.constant 0 : i32
    return %c0_i32, %c0_i32_0, %c0_i32_1 : i32, i32, i32
  }
  func.func @transform_5(%arg0: i32) -> (i32, i32) {
    %c0_i32 = arith.constant 0 : i32
    %c0_i32_0 = arith.constant 0 : i32
    %c0_i32_1 = arith.constant 0 : i32
    return %c0_i32, %c0_i32_0 : i32, i32
  }
  func.func @transform_6(%arg0: i32) -> (i32, i32) {
    %c0_i32 = arith.constant 0 : i32
    %c0_i32_0 = arith.constant 0 : i32
    %c0_i32_1 = arith.constant 0 : i32
    return %c0_i32, %c0_i32_0 : i32, i32
  }
  func.func @transform_7(%arg0: i32) -> (i32, i32, i32) {
    %c0_i32 = arith.constant 0 : i32
    %c0_i32_0 = arith.constant 0 : i32
    %c0_i32_1 = arith.constant 0 : i32
    return %arg0, %c0_i32, %c0_i32_0 : i32, i32, i32
  }
}

</mosaic_0001>

<bundles_post_ra>
// kernel: tpu_custom_call.1
= control target key start
LH: loop header
LB: loop body
LE: loop exit
PB: predicated region body
PF: predicated region fallthrough
CT: control target
= control target key end

     0   :  { %12 = vsyncpa [#allocation4], 0  ;;  %s1473_s0 = inlined_call_operand.vmem [shape: f32[2,4,128], index: 0, kind: input, shape index: {}]   ;;  %s1474_s1 = inlined_call_operand.vmem [shape: f32[8,4], index: 1, kind: input, shape index: {}]   ;;  %s1475_s2 = inlined_call_operand.vmem [shape: f32[8,1], index: 2, kind: input, shape index: {}]   ;;  %s1476_s3 = inlined_call_operand.vmem [shape: f32[4,16,32], index: 3, kind: input, shape index: {}]   ;;  %s1477_s4 = inlined_call_operand.vmem [shape: f32[4,16,1], index: 4, kind: input, shape index: {}]   ;;  %s1478_s5 = inlined_call_operand.vmem [shape: f32[8,8], index: 5, kind: input, shape index: {}]   ;;  %s1479_s6 = inlined_call_operand.vmem [shape: f32[8,1], index: 6, kind: input, shape index: {}]   ;;  %s1480_s7 = inlined_call_operand.hbm [shape: f32[2,8,128], index: 7, kind: output, shape index: {}]  }
   0x1   :  { %14 = vsyncpa [#allocation4 + $0x1], 0  ;;  %s1306_s24 = smov 0   ;;  %s1308_s25 = smov 0  }
   0x2   :  { %s1310_s26 = smov 0   ;;  %s1312_s27 = smov 0  }
   0x3 LB: > { %s1327_s28 = sadd.s32 4294967295, %s1256_s27   ;;  %s997_s29 = sadd.s32 4294967294, %s1256_s27   ;;  %s1256_s27 = sphi %s1312_s27, %s1486_s27   ;;  %s1252_s26 = sphi %s1310_s26, %s1485_s26   ;;  %s1248_s25 = sphi %s1308_s25, %s1484_s25   ;;  %s1244_s24 = sphi %s1306_s24, %s1483_s24  }
   0x4   : > { %s1331_s30 = sadd.s32 1, %s1256_s27   ;;  %s179_s8 = sadd.s32 1, %s1252_s26 }
   0x5   : > { %s176_s9 = ssub.s32 %s1256_s27, %s1331_s30  ;;  %p189_p0 = scmp.ne.s32.totalorder %s1252_s26, %s1248_s25 }
   0x6   : > { %p177_p1 = scmp.eq.s32.totalorder %s176_s9, 0  ;;  %p190_p2 = scmp.eq.s32.totalorder %s1327_s28, 1 }
   0x7   : > { %p195_p3 = scmp.ne.s32.totalorder %s1248_s25, %s1244_s24  ;;  %p196_p4 = scmp.eq.s32.totalorder %s997_s29, 1 }
   0x8   : > { %s1342_s10 = scalar_select %p177_p1, %s1252_s26, %s179_s8  }
   0x9   : > { %p1344_p5 = por %p190_p2, %p189_p0  ;;  %p1348_p6 = por %p196_p4, %p195_p3 }
   0xa   : > { %p1000_p7 = scmp.ge.s32.totalorder %s1256_s27, 1  ;;  %p239_p8 = scmp.lt.s32.totalorder %s1256_s27, 3 }
   0xc   : > { %p240_p9 = pnand %p1000_p7, %p239_p8 }
   0xd   : > { %p270_p10 = scmp.lt.s32.totalorder (!%p240_p9), %s1327_s28, 1  ;;  %s1261_s22 = smov (!%p240_p9), 1  }
   0xe   : > { %243 = sbr.rel (%p240_p9) target bundleno = 1843 (0x733), region = 48  ;;  %s1262_s17 = smov (!%p240_p9), 2  }
   0xf   : > { %s1263_s9 = smov (!%p240_p9), 4   ;;  %s1264_s21 = smov (!%p240_p9), 8  }
  0x10   : > { %s267_s20 = sand.u32 (!%p240_p9), 1, %s1248_s25  }
  0x11   : > { %s925_s14 = scalar_lea.sflag (!%p240_p9), [#allocation4], %s267_s20 }
  0x13   : > { %v1258_v0 = vmov 0.0   ;;  %vm1259_vm0 = vmmov 0   ;;  %v276_v1 = vld [vmem:[%s1475_s2] sm:$0xff]  ;;  %s271_s15 = scalar_select %p270_p10, %s1327_s28, 1  ;;  %v1260_v2 = vmov 0   ;;  %vm286_vm1 = vcmask 1043456  }
  0x14   : > { %1070 = vmatprep.subr.mxu0 %v1258_v0  ;;  %1072 = vmatprep.mubr.msk.f32.mxu0 %vm1259_vm0, %v1258_v0  ;;  %v275_v3 = vld [vmem:[%s1474_s1] sm:$0xff]  ;;  %vm282_vm2 = vcmask 31744   ;;  %vm398_vm3 = vcmask 261120   ;;  %v387_v16 = vld [vmem:[%s1477_s4 + $0x8] sm:$0xff]  ;;  %v360_v17 = vlaneseq  ;;  %v1012_v33 = vld [vmem:[%s1477_s4 + $0x18] sm:$0xff]  ;;  %vm848_vm12 = vcmask 64512  }
  0x15   : > { %1170 = vset.pattern.permute.xlu0 %v1260_v2  ;;  %1171 = vset.pattern.permute.xlu1 %v1260_v2  ;;  %s1002_s16 = sshll.u32 %s271_s15, 2  ;;  %v380_v13 = vld [vmem:[%s1476_s3] sm:$0xff]  ;;  %v381_v22 = vld [vmem:[%s1476_s3 + $0x8] sm:$0xff]  ;;  %v1009_v35 = vld [vmem:[%s1476_s3 + $0x10] sm:$0xff] }
  0x16   : > { %279 = vperm.xlu0 %1170, %v276_v1   ;;  %s273_s19 = scalar_lea.vmem %s1473_s0, %s1002_s16  ;;  %1083 = vmatprep.mubr.msk.f32.mxu1 %vm398_vm3, %v380_v13  ;;  %v386_v15 = vld [vmem:[%s1477_s4] sm:$0xff]  ;;  %v1378_v18 = vand.u32 127, %v360_v17  ;;  %v1011_v37 = vld [vmem:[%s1477_s4 + $0x10] sm:$0xff]  ;;  %v1010_v41 = vld [vmem:[%s1476_s3 + $0x18] sm:$0xff]  ;;  %s1265_s16 = smov [#allocation3]  }
  0x17   : > { %v274_v4 = vld [vmem:[%s273_s19] sm:$0xf]  ;;  %v1019_v52 = vld [vmem:[%s1477_s4 + $0x28] sm:$0xff] }
  0x18   : > { %1071 = vmatpush3.msk.msra.mxu0 %vm286_vm1, %v274_v4  ;;  %vm369_vm4 = vcmp.lt.s32.totalorder %v1378_v18, 1  ;;  %vm488_vm6 = vcmp.lt.s32.totalorder %v1378_v18, 2  ;;  %v1016_v54 = vld [vmem:[%s1476_s3 + $0x20] sm:$0xff]  ;;  %vm608_vm8 = vcmp.lt.s32.totalorder %v1378_v18, 4  ;;  %v1017_v60 = vld [vmem:[%s1476_s3 + $0x28] sm:$0xff]  ;;  %vm728_vm10 = vcmp.lt.s32.totalorder %v1378_v18, 8 }
  0x19   : > { %1073 = vmatmul.mubr.msk.f32.vlgmr.msra.gmra.mxu0 %vm282_vm2, %v275_v3  ;;  %vm1034_vm5 = vmneg %vm369_vm4  ;;  %v1018_v56 = vld [vmem:[%s1477_s4 + $0x20] sm:$0xff] }
  0x1a   : > { %1094 = vmatprep.mubr.msk.f32.mxu0 %vm398_vm3, %v1009_v35  ;;  %vm1036_vm7 = vmneg %vm488_vm6 }
  0x1b   : > { %vm1038_vm9 = vmneg %vm608_vm8 }
  0x1c   : > { %vm1040_vm11 = vmneg %vm728_vm10 }
  0x91   : > { %v280_v5 = vpop.permute.xlu0 %279 }
  0xd9   : > { %v356_v6 = vpop.f32.mrf.mxu0 }
  0xda   : > { %v357_v7 = vadd.f32 %v356_v6, %v280_v5 }
  0xdb   : > { %v1074_v8 = vpop.f32.mrf.mxu0 }
  0xdc   : > { %1172 = vtanh.f32 %v357_v7  ;;  %v1005_v9 = vmul.f32 -1.442695, %v357_v7  ;;  %v1026_v8 = vld [vmem:[%s1477_s4 + $0x38] sm:$0xff] }
  0xde   : > { %1174 = vpow2.f32 %v1005_v9 }
  0xe9   : > { %v1173_v10 = vpop.eup %1172 }
  0xea   : > { %370 = vrot.lane.b32.xlu1 %v1173_v10, %s1261_s22 }
  0xeb   : > { %v1175_v11 = vpop.eup %1174 }
  0xec   : > { %v366_v12 = vadd.f32 1.0, %v1175_v11  ;;  %v1025_v11 = vld [vmem:[%s1477_s4 + $0x30] sm:$0xff] }
  0xee   : > { %1176 = vrcp.f32 %v366_v12  ;;  %390 = vperm.xlu1 %1171, %v386_v15   ;;  %v842_v12 = vld [vmem:[%s1479_s6] sm:$0xff] }
  0xfb   : > { %v1177_v14 = vpop.eup %1176 }
  0xfc   : > { %373 = vrot.lane.b32.xlu0 %v1177_v14, %s1261_s22  ;;  %1075 = vmatprep.subr.mxu1 %v1177_v14  ;;  %s1031_s22 = sshll.u32 %s1327_s28, 7 }
  0xfd   : > { %1076 = vmatpush3.msra.mxu1 %v1177_v14  ;;  %s936_s13 = scalar_lea.hbm %s1480_s7, %s1031_s22 }
 0x100   : > { %395 = vperm.xlu0 %1170, %v387_v16   ;;  %v1024_v16 = vld [vmem:[%s1476_s3 + $0x38] sm:$0xff] }
 0x15c   : > { %v371_v21 = vpop.permute.xlu1 %370 }
 0x169   : > { %v391_v24 = vpop.permute.xlu1 %390 }
 0x16e   : > { %v374_v19 = vpop.permute.xlu0 %373 }
 0x16f   : > { %v375_v20 = vsel %vm369_vm4, 0.5, %v374_v19 }
 0x170   : > { %1077 = vmatprep.subr.mxu1 %v375_v20 }
 0x171   : > { %1078 = vmatpush3.msra.mxu1 %v375_v20 }
 0x172   : > { %1079 = vmatprep.subr.mxu1 %v1173_v10 }
 0x173   : > { %1080 = vmatpush3.msra.mxu1 %v1173_v10 }
 0x174   : > { %1081 = vmatprep.subr.msk.mxu1 %vm1034_vm5, %v371_v21 }
 0x175   : > { %1082 = vmatpush3.msk.msra.mxu1 %vm1034_vm5, %v371_v21 }
 0x176   : > { %1084 = vmatmul.mubr.msk.f32.vlgmr.msra.gmra.mxu1 %vm398_vm3, %v381_v22 }
 0x177   : > { %1105 = vmatprep.mubr.msk.f32.mxu1 %vm398_vm3, %v1016_v54 }
 0x17b   : > { %v396_v25 = vpop.permute.xlu0 %395 }
 0x236   : > { %v1085_v23 = vpop.f32.mrf.mxu1 }
 0x237   : > { %v477_v27 = vadd.f32 %v1085_v23, %v396_v25 }
 0x238   : > { %v471_v26 = vpop.f32.mrf.mxu1 }
 0x239   : > { %v472_v28 = vadd.f32 %v471_v26, %v391_v24  ;;  %v841_v24 = vld [vmem:[%s1478_s5] sm:$0xff] }
 0x23b   : > { %v480_v29 = vmul.f32 %v477_v27, %v472_v28 }
 0x23d   : > { %1178 = vtanh.f32 %v480_v29  ;;  %v1008_v30 = vmul.f32 -1.442695, %v480_v29 }
 0x23f   : > { %1180 = vpow2.f32 %v1008_v30 }
 0x24a   : > { %v1179_v31 = vpop.eup %1178 }
 0x24b   : > { %489 = vrot.lane.b32.xlu0 %v1179_v31, %s1262_s17 }
 0x24c   : > { %v1181_v32 = vpop.eup %1180 }
 0x24d   : > { %v485_v34 = vadd.f32 1.0, %v1181_v32 }
 0x24f   : > { %1182 = vrcp.f32 %v485_v34  ;;  %516 = vperm.xlu0 %1170, %v1012_v33  }
 0x25c   : > { %v1183_v36 = vpop.eup %1182 }
 0x25d   : > { %492 = vrot.lane.b32.xlu1 %v1183_v36, %s1262_s17  ;;  %1086 = vmatprep.subr.mxu0 %v1183_v36  ;;  %s1200_s17 = sshll.u32 %s1265_s16, 4  ;;  %s1201_s17 = int_to_ptr.vmem [resolvable:$false] %s1200_s17 }
 0x25e   : > { %1087 = vmatpush3.msra.mxu0 %v1183_v36  ;;  %s1202_s28 = scalar_lea.vmem %s1201_s17, 256 }
 0x261   : > { %511 = vperm.xlu1 %1171, %v1011_v37  }
 0x2bd   : > { %v490_v40 = vpop.permute.xlu0 %489 }
 0x2ca   : > { %v517_v43 = vpop.permute.xlu0 %516 }
 0x2cf   : > { %v493_v38 = vpop.permute.xlu1 %492 }
 0x2d0   : > { %v494_v39 = vsel %vm488_vm6, 0.5, %v493_v38 }
 0x2d1   : > { %1088 = vmatprep.subr.mxu0 %v494_v39 }
 0x2d2   : > { %1089 = vmatpush3.msra.mxu0 %v494_v39 }
 0x2d3   : > { %1090 = vmatprep.subr.mxu0 %v1179_v31 }
 0x2d4   : > { %1091 = vmatpush3.msra.mxu0 %v1179_v31 }
 0x2d5   : > { %1092 = vmatprep.subr.msk.mxu0 %vm1036_vm7, %v490_v40 }
 0x2d6   : > { %1093 = vmatpush3.msk.msra.mxu0 %vm1036_vm7, %v490_v40 }
 0x2d7   : > { %1095 = vmatmul.mubr.msk.f32.vlgmr.msra.gmra.mxu0 %vm398_vm3, %v1010_v41 }
 0x2dc   : > { %v512_v44 = vpop.permute.xlu1 %511 }
 0x397   : > { %v1096_v42 = vpop.f32.mrf.mxu0 }
 0x398   : > { %v597_v46 = vadd.f32 %v1096_v42, %v517_v43 }
 0x399   : > { %v591_v45 = vpop.f32.mrf.mxu0 }
 0x39a   : > { %v592_v47 = vadd.f32 %v591_v45, %v512_v44 }
 0x39c   : > { %v600_v48 = vmul.f32 %v597_v46, %v592_v47 }
 0x39e   : > { %1184 = vtanh.f32 %v600_v48  ;;  %v1015_v49 = vmul.f32 -1.442695, %v600_v48 }
 0x3a0   : > { %1186 = vpow2.f32 %v1015_v49 }
 0x3ab   : > { %v1185_v50 = vpop.eup %1184 }
 0x3ac   : > { %609 = vrot.lane.b32.xlu0 %v1185_v50, %s1263_s9 }
 0x3ad   : > { %v1187_v51 = vpop.eup %1186 }
 0x3ae   : > { %v605_v53 = vadd.f32 1.0, %v1187_v51 }
 0x3b0   : > { %1188 = vrcp.f32 %v605_v53  ;;  %636 = vperm.xlu0 %1170, %v1019_v52  }
 0x3bd   : > { %v1189_v55 = vpop.eup %1188 }
 0x3be   : > { %612 = vrot.lane.b32.xlu1 %v1189_v55, %s1263_s9  ;;  %1097 = vmatprep.subr.mxu1 %v1189_v55 }
 0x3bf   : > { %1098 = vmatpush3.msra.mxu1 %v1189_v55 }
 0x3c2   : > { %631 = vperm.xlu1 %1171, %v1018_v56  }
 0x41e   : > { %v610_v59 = vpop.permute.xlu0 %609 }
 0x42b   : > { %v637_v62 = vpop.permute.xlu0 %636 }
 0x430   : > { %v613_v57 = vpop.permute.xlu1 %612 }
 0x431   : > { %v614_v58 = vsel %vm608_vm8, 0.5, %v613_v57 }
 0x432   : > { %1099 = vmatprep.subr.mxu1 %v614_v58 }
 0x433   : > { %1100 = vmatpush3.msra.mxu1 %v614_v58 }
 0x434   : > { %1101 = vmatprep.subr.mxu1 %v1185_v50 }
 0x435   : > { %1102 = vmatpush3.msra.mxu1 %v1185_v50 }
 0x436   : > { %1103 = vmatprep.subr.msk.mxu1 %vm1038_vm9, %v610_v59 }
 0x437   : > { %1104 = vmatpush3.msk.msra.mxu1 %vm1038_vm9, %v610_v59 }
 0x438   : > { %1106 = vmatmul.mubr.msk.f32.vlgmr.msra.gmra.mxu1 %vm398_vm3, %v1017_v60  ;;  %1119 = vmatprep.subr.mxu1 %v1258_v0 }
 0x439   : > { %1121 = vmatprep.mubr.msk.f32.mxu1 %vm1259_vm0, %v1258_v0  ;;  %v1023_v0 = vld [vmem:[%s1476_s3 + $0x30] sm:$0xff] }
 0x43a   : > { %1116 = vmatprep.mubr.msk.f32.mxu0 %vm398_vm3, %v1023_v0 }
 0x43d   : > { %v632_v63 = vpop.permute.xlu1 %631 }
 0x4f8   : > { %v1107_v61 = vpop.f32.mrf.mxu1 }
 0x4f9   : > { %v717_v2 = vadd.f32 %v1107_v61, %v637_v62 }
 0x4fa   : > { %v711_v1 = vpop.f32.mrf.mxu1 }
 0x4fb   : > { %v712_v3 = vadd.f32 %v711_v1, %v632_v63 }
 0x4fd   : > { %v720_v4 = vmul.f32 %v717_v2, %v712_v3 }
 0x4ff   : > { %1190 = vtanh.f32 %v720_v4  ;;  %v1022_v5 = vmul.f32 -1.442695, %v720_v4 }
 0x501   : > { %1192 = vpow2.f32 %v1022_v5 }
 0x50c   : > { %v1191_v6 = vpop.eup %1190 }
 0x50d   : > { %729 = vrot.lane.b32.xlu0 %v1191_v6, %s1264_s21 }
 0x50e   : > { %v1193_v7 = vpop.eup %1192 }
 0x50f   : > { %v725_v9 = vadd.f32 1.0, %v1193_v7 }
 0x511   : > { %1194 = vrcp.f32 %v725_v9  ;;  %756 = vperm.xlu0 %1170, %v1026_v8  }
 0x51e   : > { %v1195_v10 = vpop.eup %1194 }
 0x51f   : > { %732 = vrot.lane.b32.xlu1 %v1195_v10, %s1264_s21  ;;  %1108 = vmatprep.subr.mxu0 %v1195_v10  ;;  %s1001_s21 = sshll.u32 %s267_s20, 3 }
 0x520   : > { %1109 = vmatpush3.msra.mxu0 %v1195_v10  ;;  %s269_s23 = scalar_lea.vmem [#allocation3], %s1001_s21 }
 0x521   : > { %s938_s29 = sshll.u32 %s269_s23, 4  ;;  %s939_s29 = int_to_ptr.vmem [resolvable:$true] %s938_s29 }
 0x522   : > { %s1196_s15 = scalar_lea.vmem %s939_s29, 128  ;;  %p1203_p0 = scmp.lt.s32.totalorder %s939_s29, %s1201_s17 }
 0x523   : > { %751 = vperm.xlu1 %1171, %v1025_v11   ;;  %p1197_p11 = scmp.ne.s32.totalorder %s939_s29, %s1196_s15  ;;  %p1204_p1 = scmp.lt.s32.totalorder %s1202_s28, %s1196_s15 }
 0x525   : > { %p1198_p12 = pnand %p1197_p11, %p1344_p5  ;;  %p1205_p2 = por %p1204_p1, %p1203_p0 }
 0x527   : > { %845 = vperm.xlu1 %1171, %v842_v12   ;;  %p1199_p13 = pneg %p1198_p12 }
 0x529   : > { %p1206_p3 = pnand %p1205_p2, %p1199_p13 }
 0x57f   : > { %v730_v15 = vpop.permute.xlu0 %729 }
 0x58c   : > { %v757_v18 = vpop.permute.xlu0 %756 }
 0x591   : > { %v733_v13 = vpop.permute.xlu1 %732 }
 0x592   : > { %v734_v14 = vsel %vm728_vm10, 0.5, %v733_v13 }
 0x593   : > { %1110 = vmatprep.subr.mxu0 %v734_v14 }
 0x594   : > { %1111 = vmatpush3.msra.mxu0 %v734_v14 }
 0x595   : > { %1112 = vmatprep.subr.mxu0 %v1191_v6 }
 0x596   : > { %1113 = vmatpush3.msra.mxu0 %v1191_v6 }
 0x597   : > { %1114 = vmatprep.subr.msk.mxu0 %vm1040_vm11, %v730_v15 }
 0x598   : > { %1115 = vmatpush3.msk.msra.mxu0 %vm1040_vm11, %v730_v15 }
 0x599   : > { %1117 = vmatmul.mubr.msk.f32.vlgmr.msra.gmra.mxu0 %vm398_vm3, %v1024_v16 }
 0x59e   : > { %v752_v19 = vpop.permute.xlu1 %751 }
 0x5a2   : > { %v846_v25 = vpop.permute.xlu1 %845 }
 0x659   : > { %v1118_v17 = vpop.f32.mrf.mxu0 }
 0x65a   : > { %v837_v21 = vadd.f32 %v1118_v17, %v757_v18 }
 0x65b   : > { %v831_v20 = vpop.f32.mrf.mxu0 }
 0x65c   : > { %v832_v22 = vadd.f32 %v831_v20, %v752_v19 }
 0x65e   : > { %v840_v23 = vmul.f32 %v837_v21, %v832_v22 }
 0x660   : > { %1120 = vmatpush3.msra.mxu1 %v840_v23 }
 0x661   : > { %1122 = vmatmul.mubr.msk.f32.vlgmr.msra.gmra.mxu1 %vm848_vm12, %v841_v24 }
 0x721   : > { %v918_v26 = vpop.f32.mrf.mxu1 }
 0x722   : > { %v919_v27 = vadd.f32 %v918_v26, %v846_v25 }
 0x723   : > { %v1123_v28 = vpop.f32.mrf.mxu1 }
 0x724   : > { %v922_v29 = vmax.f32 %v919_v27, 0.0 }
 0x726   : > { %923 = vst [vmem:[%s269_s23] sm:$0xff] %v922_v29 }
 0x727   : > { %1209 = shalt.err (!%p1206_p3)
}
 0x728   : > { %s1210_s18 = scalar_lea.hbm %s936_s13, 128  ;;  %s1214_s21 = scalar_lea.hbm %s1480_s7, 256 }
 0x729   : > { %p1211_p4 = scmp.ne.s32.totalorder %s936_s13, %s1210_s18  ;;  %p1215_p9 = scmp.lt.s32.totalorder %s936_s13, %s1480_s7 }
 0x72a   : > { %p1216_p10 = scmp.lt.s32.totalorder %s1214_s21, %s1210_s18 }
 0x72b   : > { %p1212_p7 = pnand %p1211_p4, %p1344_p5 }
 0x72c   : > { %p1217_p11 = por %p1216_p10, %p1215_p9 }
 0x72d   : > { %p1213_p8 = pneg %p1212_p7 }
 0x72f   : > { %p1218_p12 = pnand %p1217_p11, %p1213_p8 }
 0x731   : > { %1221 = shalt.err (!%p1218_p12)
}
 0x732   : > { %1124 = dma.vmem_to_hbm [thread:$0]  (%p1344_p5), %s939_s29, 128, %s936_s13, %s925_s14  }
 0x733 PF: > { %p1130_p13 = scmp.ge.s32.totalorder %s1256_s27, 2  ;;  %s950_s8 = sand.u32 1, %s1244_s24  }
 0x734   : > { %s951_s9 = scalar_lea.sflag [#allocation4], %s950_s8 }
 0x735   : > { %p1127_p0 = pnand %p1130_p13, %p1348_p6 }
 0x737   : > { %p1128_p1 = pneg %p1127_p0 }
 0x739   : > { %1239 = dma.done.wait (%p1128_p1), %s951_s9, 128  }
 0x73a   : > { %1241 = vsyncadd (%p1128_p1), %s951_s9, 4294967168  ;;  %p17_p2 = scmp.ge.s32.totalorder %s1331_s30, 4   ;;  %s1483_s24 = smov %s1248_s25 }
 0x73b   : > { %s1484_s25 = smov %s1252_s26  ;;  %s1485_s26 = smov %s1342_s10 }
 0x73c   : > { %s1486_s27 = smov %s1331_s30  ;;  %19 = sbr.rel (!%p17_p2) target bundleno = 3 (0x3), region = 89 }
 0x741   :  { %956 = vsyncpa [#allocation4], 1 }
 0x742   :  { %958 = vsyncpa [#allocation4 + $0x1], 1 }

</bundles_post_ra>
